<compile_context>
chip_gen: v7x
topology: tpu7x:2x2x1
jax: 0.10.0
libtpu: 0.0.40
codegen_flags: <defaults>
</compile_context>

<pallas_src>
import functools
import math

import jax
import jax.numpy as jnp
from jax.experimental import pallas as pl
from jax.experimental.pallas import tpu as pltpu


def _round_up(x, m):
    return (x + m - 1) // m * m


def _gelu_tanh(x):
    # GELU(approximate='tanh'):
    # 0.5 * x * (1 + tanh(sqrt(2/pi) * (x + 0.044715 * x^3)))
    c = math.sqrt(2.0 / math.pi)
    return 0.5 * x * (1.0 + jnp.tanh(c * (x + 0.044715 * x * x * x)))


@functools.lru_cache(maxsize=1)
def _vmem_limit_bytes():
    # Per-chip scoped-VMEM budget with headroom (v5e/v6e: 128 MiB physical ->
    # ~110 MiB; v7x: 64 MiB/TC -> ~54 MiB). Conservative fallback if the
    # hardware query is unavailable.
    try:
        cap = pltpu.get_tpu_info().vmem_capacity_bytes
    except Exception:
        return 48 * 1024 * 1024
    return min(int(cap * 0.85), 110 * 1024 * 1024)


def _pick_m_tile(M, block_m, sub):
    # Shrink the tile toward ceil(M / n_tiles) (rounded to the sublane
    # multiple) so last-tile padding waste is minimal.
    tm0 = max(sub, min(_round_up(block_m, sub), _round_up(M, sub)))
    n_tiles = -(-M // tm0)
    tm = _round_up(-(-M // n_tiles), sub)
    return tm, n_tiles * tm


def _pick_h_chunk(H, block_h):
    # Largest MXU-friendly chunk (multiple of 256, falling back to 128) that
    # divides H and does not exceed block_h.
    if H <= block_h:
        return H
    for mult in (256, 128):
        best = 0
        c = mult
        while c <= block_h:
            if H % c == 0:
                best = c
            c += mult
        if best:
            return best
    return H  # single chunk fallback (H not 128-divisible is rejected earlier)


def _mlp_kernel(x_ref, w1_ref, b1_ref, w2_ref, b2_ref, o_ref, acc_ref):
    # x_ref:  (TM, E)   w1_ref: (E, TH)   b1_ref: (1, TH)
    # w2_ref: (TH, E)   b2_ref: (1, E)    o_ref:  (TM, E)
    # acc_ref: (TM, E) f32 scratch, accumulates c_proj over H chunks.
    h_idx = pl.program_id(1)

    @pl.when(h_idx == 0)
    def _():
        acc_ref[...] = jnp.zeros_like(acc_ref)

    # c_fc chunk: storage-dtype operands (bf16 fast path), f32 MXU accumulate.
    h = jnp.dot(x_ref[...], w1_ref[...], preferred_element_type=jnp.float32)
    h = h + b1_ref[...].astype(jnp.float32)          # broadcast (1, TH) over rows
    h = _gelu_tanh(h)                                # f32 elementwise (VPU + EUP tanh)

    # c_proj chunk: accumulate (TM, E) partials in f32.
    acc_ref[...] += jnp.dot(h.astype(w2_ref.dtype), w2_ref[...],
                            preferred_element_type=jnp.float32)

    @pl.when(h_idx == pl.num_programs(1) - 1)
    def _():
        o_ref[...] = (acc_ref[...] + b2_ref[...].astype(jnp.float32)).astype(o_ref.dtype)


@functools.partial(jax.jit, static_argnames=("block_m", "block_h"))
def mlp_forward(x, w1_t, b1, w2_t, b2, *, block_m=256, block_h=512):
    """Fused GPT MLP forward.

    x:    (B, T, E)
    w1_t: (E, 4E)   c_fc weight, stored transposed as (in, out)
    b1:   (4E,)
    w2_t: (4E, E)   c_proj weight, stored transposed as (in, out)
    b2:   (E,)
    """
    B, T, E = x.shape
    H = w1_t.shape[1]
    assert E % 128 == 0 and H % 128 == 0, (
        "n_embd and 4*n_embd must be multiples of 128 (lane width); pad in the caller")

    M = B * T
    sub = 16 if x.dtype == jnp.bfloat16 else 8       # bf16 packs 2 rows/sublane
    tm, m_pad = _pick_m_tile(M, block_m, sub)
    th = _pick_h_chunk(H, block_h)

    x2d = x.reshape(M, E)
    if m_pad != M:
        x2d = jnp.pad(x2d, ((0, m_pad - M), (0, 0)))
    b1_2d = b1.reshape(1, H)
    b2_2d = b2.reshape(1, E)

    grid = (m_pad // tm, H // th)                    # (M tiles, H chunks)

    out2d = pl.pallas_call(
        _mlp_kernel,
        out_shape=jax.ShapeDtypeStruct((m_pad, E), x.dtype),
        grid_spec=pltpu.PrefetchScalarGridSpec(
            num_scalar_prefetch=0,
            grid=grid,
            in_specs=[
                pl.BlockSpec((tm, E), lambda i, h: (i, 0)),   # x: resident across h
                pl.BlockSpec((E, th), lambda i, h: (0, h)),   # w1 chunk, streamed over h
                pl.BlockSpec((1, th), lambda i, h: (0, h)),   # b1 chunk
                pl.BlockSpec((th, E), lambda i, h: (h, 0)),   # w2 chunk, streamed over h
                pl.BlockSpec((1, E), lambda i, h: (0, 0)),    # b2: constant (tiny)
            ],
            out_specs=pl.BlockSpec((tm, E), lambda i, h: (i, 0)),
            scratch_shapes=[pltpu.VMEM((tm, E), jnp.float32)],
        ),
        compiler_params=pltpu.CompilerParams(
            dimension_semantics=("parallel", "arbitrary"),    # M parallel, H reduction
            vmem_limit_bytes=_vmem_limit_bytes(),
        ),
    )(x2d, w1_t, b1_2d, w2_t, b2_2d)

    if m_pad != M:
        out2d = out2d[:M]
    return out2d.reshape(B, T, E)


def _reference(x, w1_t, b1, w2_t, b2):
    xf = x.astype(jnp.float32)
    h = jnp.einsum("bte,eh->bth", xf, w1_t.astype(jnp.float32)) + b1.astype(jnp.float32)
    h = _gelu_tanh(h)
    return (jnp.einsum("bth,he->bte", h, w2_t.astype(jnp.float32))
            + b2.astype(jnp.float32))


if __name__ == "__main__":
    # Small GPT-ish config: n_embd=128 (lane-dense), hidden=4*128=512, seq=8.
    B, T, E = 2, 8, 128
    H = 4 * E

    key = jax.random.PRNGKey(0)
    kx, kw1, kb1, kw2, kb2 = jax.random.split(key, 5)

    x = jax.random.normal(kx, (B, T, E), dtype=jnp.float32)
    # Deterministic init mimicking nn.Linear's uniform(-1/sqrt(fan_in), 1/sqrt(fan_in)).
    w1_t = jax.random.uniform(kw1, (E, H), jnp.float32,
                              -1.0 / math.sqrt(E), 1.0 / math.sqrt(E))
    b1 = jax.random.uniform(kb1, (H,), jnp.float32,
                            -1.0 / math.sqrt(E), 1.0 / math.sqrt(E))
    w2_t = jax.random.uniform(kw2, (H, E), jnp.float32,
                              -1.0 / math.sqrt(H), 1.0 / math.sqrt(H))
    b2 = jax.random.uniform(kb2, (E,), jnp.float32,
                            -1.0 / math.sqrt(H), 1.0 / math.sqrt(H))

    ref = _reference(x, w1_t, b1, w2_t, b2)

    # f32 storage path; block_h=256 forces 2 H chunks to exercise accumulation.
    out_f32 = jax.block_until_ready(mlp_forward(x, w1_t, b1, w2_t, b2, block_h=256))
    assert out_f32.shape == (B, T, E)
    assert jnp.allclose(out_f32, ref, atol=1e-4, rtol=1e-4), "f32 mismatch vs reference"

    # bf16 weights/activations path (MXU-native storage dtype, f32 accumulate),
    # default block_h (single H chunk at this small H).
    out_bf16 = jax.block_until_ready(
        mlp_forward(x.astype(jnp.bfloat16),
                    w1_t.astype(jnp.bfloat16), b1.astype(jnp.bfloat16),
                    w2_t.astype(jnp.bfloat16), b2.astype(jnp.bfloat16)))
    assert out_bf16.shape == (B, T, E)
    assert out_bf16.dtype == jnp.bfloat16
    max_err = jnp.max(jnp.abs(out_bf16.astype(jnp.float32) - ref))
    assert max_err < 1e-1, f"bf16 mismatch vs reference (max abs err {max_err})"

    print("KERNEL_OK")
</pallas_src>

<mosaic_0001>
module attributes {stable_mosaic.version = 11 : i64} {
  func.func @_mlp_kernel(%arg0: i32, %arg1: i32, %arg2: memref<16x128xf32, #tpu.memory_space<vmem>>, %arg3: memref<128x256xf32, #tpu.memory_space<vmem>>, %arg4: memref<1x256xf32, #tpu.memory_space<vmem>>, %arg5: memref<256x128xf32, #tpu.memory_space<vmem>>, %arg6: memref<1x128xf32, #tpu.memory_space<vmem>>, %arg7: memref<16x128xf32, #tpu.memory_space<vmem>>, %arg8: memref<16x128xf32, #tpu.memory_space<vmem>>) attributes {dimension_semantics = [#tpu.dimension_semantics<parallel>, #tpu.dimension_semantics<arbitrary>], iteration_bounds = array<i64: 1, 2>, scalar_prefetch = 0 : i64, scratch_operands = 1 : i64, tpu.core_type = #tpu.core_type<tc>, window_params = [{transform_indices = @transform_0, window_bounds = array<i64: 16, 128>}, {transform_indices = @transform_1, window_bounds = array<i64: 128, 256>}, {transform_indices = @transform_2, window_bounds = array<i64: 1, 256>}, {transform_indices = @transform_3, window_bounds = array<i64: 256, 128>}, {pipeline_mode = #tpu.pipeline_mode<synchronous>, transform_indices = @transform_4, window_bounds = array<i64: 1, 128>}, {transform_indices = @transform_5, window_bounds = array<i64: 16, 128>}]} {
    %c0_i32 = arith.constant 0 : i32
    %0 = arith.cmpi eq, %arg1, %c0_i32 : i32
    %1 = arith.extui %0 : i1 to i32
    %c0_i32_0 = arith.constant 0 : i32
    %2 = arith.cmpi ne, %1, %c0_i32_0 : i32
    scf.if %2 {
      %cst_18 = arith.constant 0.000000e+00 : f32
      %30 = vector.broadcast %cst_18 : f32 to vector<16x128xf32>
      %c0_19 = arith.constant 0 : index
      %c0_20 = arith.constant 0 : index
      %31 = vector.load %arg8[%c0_19, %c0_20] : memref<16x128xf32, #tpu.memory_space<vmem>>, vector<16x128xf32>
      tpu.vector_store %arg8[%c0_19, %c0_20], %30 {strides = array<i32>} : memref<16x128xf32, #tpu.memory_space<vmem>>, vector<16x128xf32>,
    } else {
    }
    %c0 = arith.constant 0 : index
    %c0_1 = arith.constant 0 : index
    %3 = vector.load %arg2[%c0, %c0_1] : memref<16x128xf32, #tpu.memory_space<vmem>>, vector<16x128xf32>
    %c0_2 = arith.constant 0 : index
    %c0_3 = arith.constant 0 : index
    %4 = vector.load %arg3[%c0_2, %c0_3] : memref<128x256xf32, #tpu.memory_space<vmem>>, vector<128x256xf32>
    %cst = arith.constant dense<0.000000e+00> : vector<16x256xf32>
    %5 = tpu.matmul %3, %4, %cst {dimension_numbers = #tpu.dot_dimension_numbers<[1], [0], [0], [1], [0, 0, 1, 1], [], []>} : vector<16x128xf32>, vector<128x256xf32>, vector<16x256xf32> -> vector<16x256xf32>
    %c0_4 = arith.constant 0 : index
    %c0_5 = arith.constant 0 : index
    %6 = vector.load %arg4[%c0_4, %c0_5] : memref<1x256xf32, #tpu.memory_space<vmem>>, vector<1x256xf32>
    %7 = vector.broadcast %6 : vector<1x256xf32> to vector<16x256xf32>
    %8 = arith.addf %5, %7 : vector<16x256xf32>
    %cst_6 = arith.constant 5.000000e-01 : f32
    %9 = vector.broadcast %cst_6 : f32 to vector<16x256xf32>
    %10 = arith.mulf %9, %8 : vector<16x256xf32>
    %cst_7 = arith.constant 4.471500e-02 : f32
    %11 = vector.broadcast %cst_7 : f32 to vector<16x256xf32>
    %12 = arith.mulf %11, %8 : vector<16x256xf32>
    %13 = arith.mulf %12, %8 : vector<16x256xf32>
    %14 = arith.mulf %13, %8 : vector<16x256xf32>
    %15 = arith.addf %8, %14 : vector<16x256xf32>
    %cst_8 = arith.constant 0.797884583 : f32
    %16 = vector.broadcast %cst_8 : f32 to vector<16x256xf32>
    %17 = arith.mulf %16, %15 : vector<16x256xf32>
    %18 = math.tanh %17 : vector<16x256xf32>
    %cst_9 = arith.constant 1.000000e+00 : f32
    %19 = vector.broadcast %cst_9 : f32 to vector<16x256xf32>
    %20 = arith.addf %19, %18 : vector<16x256xf32>
    %21 = arith.mulf %10, %20 : vector<16x256xf32>
    %c0_10 = arith.constant 0 : index
    %c0_11 = arith.constant 0 : index
    %22 = vector.load %arg8[%c0_10, %c0_11] : memref<16x128xf32, #tpu.memory_space<vmem>>, vector<16x128xf32>
    %c0_12 = arith.constant 0 : index
    %c0_13 = arith.constant 0 : index
    %23 = vector.load %arg5[%c0_12, %c0_13] : memref<256x128xf32, #tpu.memory_space<vmem>>, vector<256x128xf32>
    %cst_14 = arith.constant dense<0.000000e+00> : vector<16x128xf32>
    %24 = tpu.matmul %21, %23, %cst_14 {dimension_numbers = #tpu.dot_dimension_numbers<[1], [0], [0], [1], [0, 0, 1, 1], [], []>} : vector<16x256xf32>, vector<256x128xf32>, vector<16x128xf32> -> vector<16x128xf32>
    %25 = arith.addf %22, %24 : vector<16x128xf32>
    %c0_15 = arith.constant 0 : index
    %c0_16 = arith.constant 0 : index
    %26 = vector.load %arg8[%c0_15, %c0_16] : memref<16x128xf32, #tpu.memory_space<vmem>>, vector<16x128xf32>
    tpu.vector_store %arg8[%c0_15, %c0_16], %25 {strides = array<i32>} : memref<16x128xf32, #tpu.memory_space<vmem>>, vector<16x128xf32>,
    %c1_i32 = arith.constant 1 : i32
    %27 = arith.cmpi eq, %arg1, %c1_i32 : i32
    %28 = arith.extui %27 : i1 to i32
    %c0_i32_17 = arith.constant 0 : i32
    %29 = arith.cmpi ne, %28, %c0_i32_17 : i32
    scf.if %29 {
      %c0_18 = arith.constant 0 : index
      %c0_19 = arith.constant 0 : index
      %30 = vector.load %arg8[%c0_18, %c0_19] : memref<16x128xf32, #tpu.memory_space<vmem>>, vector<16x128xf32>
      %c0_20 = arith.constant 0 : index
      %c0_21 = arith.constant 0 : index
      %31 = vector.load %arg6[%c0_20, %c0_21] : memref<1x128xf32, #tpu.memory_space<vmem>>, vector<1x128xf32>
      %32 = vector.broadcast %31 : vector<1x128xf32> to vector<16x128xf32>
      %33 = arith.addf %30, %32 : vector<16x128xf32>
      %c0_22 = arith.constant 0 : index
      %c0_23 = arith.constant 0 : index
      %34 = vector.load %arg7[%c0_22, %c0_23] : memref<16x128xf32, #tpu.memory_space<vmem>>, vector<16x128xf32>
      tpu.vector_store %arg7[%c0_22, %c0_23], %33 {strides = array<i32>} : memref<16x128xf32, #tpu.memory_space<vmem>>, vector<16x128xf32>,
    } else {
    }
    return
  }
  func.func @transform_0(%arg0: i32, %arg1: i32) -> (i32, i32) {
    %c0_i32 = arith.constant 0 : i32
    %c0_i32_0 = arith.constant 0 : i32
    return %arg0, %c0_i32 : i32, i32
  }
  func.func @transform_1(%arg0: i32, %arg1: i32) -> (i32, i32) {
    %c0_i32 = arith.constant 0 : i32
    %c0_i32_0 = arith.constant 0 : i32
    return %c0_i32, %arg1 : i32, i32
  }
  func.func @transform_2(%arg0: i32, %arg1: i32) -> (i32, i32) {
    %c0_i32 = arith.constant 0 : i32
    %c0_i32_0 = arith.constant 0 : i32
    return %c0_i32, %arg1 : i32, i32
  }
  func.func @transform_3(%arg0: i32, %arg1: i32) -> (i32, i32) {
    %c0_i32 = arith.constant 0 : i32
    %c0_i32_0 = arith.constant 0 : i32
    return %arg1, %c0_i32 : i32, i32
  }
  func.func @transform_4(%arg0: i32, %arg1: i32) -> (i32, i32) {
    %c0_i32 = arith.constant 0 : i32
    %c0_i32_0 = arith.constant 0 : i32
    %c0_i32_1 = arith.constant 0 : i32
    return %c0_i32, %c0_i32_0 : i32, i32
  }
  func.func @transform_5(%arg0: i32, %arg1: i32) -> (i32, i32) {
    %c0_i32 = arith.constant 0 : i32
    %c0_i32_0 = arith.constant 0 : i32
    return %arg0, %c0_i32 : i32, i32
  }
}

</mosaic_0001>

<bundles_post_ra>
// kernel: mlp_forward.1
= control target key start
LH: loop header
LB: loop body
LE: loop exit
PB: predicated region body
PF: predicated region fallthrough
CT: control target
= control target key end

     0   :  { %s1496_s0 = inlined_call_operand.hbm [shape: f32[16,128], index: 0, kind: input, shape index: {}]   ;;  %s1497_s1 = inlined_call_operand.hbm [shape: f32[128,512], index: 1, kind: input, shape index: {}]   ;;  %s1498_s2 = inlined_call_operand.vmem [shape: f32[1,512], index: 2, kind: input, shape index: {}]   ;;  %s1499_s3 = inlined_call_operand.hbm [shape: f32[512,128], index: 3, kind: input, shape index: {}]   ;;  %s1500_s4 = inlined_call_operand.vmem [shape: f32[1,128], index: 4, kind: input, shape index: {}]   ;;  %s1501_s5 = inlined_call_operand.hbm [shape: f32[16,128], index: 5, kind: output, shape index: {}]  }
   0x1   :  { %1508 = sst [smem:[#allocation13_spill]] %s1497_s1 }
   0x2   :  { %10 = vsyncpa [#allocation4], 0 }
   0x3   :  { %11 = vsyncpa [#allocation7], 0 }
   0x4   :  { %13 = vsyncpa [#allocation7 + $0x1], 0 }
   0x5   :  { %14 = vsyncpa [#allocation5], 0  ;;  %s1180_s18 = smov 0   ;;  %s1182_s19 = smov 0  }
   0x6   :  { %s1184_s20 = smov 0   ;;  %s1186_s21 = smov 0  }
   0x7   :  { %s1188_s22 = smov 0   ;;  %s1190_s23 = smov 0  }
   0x8 LB: > { %s29_s24 = sadd.s32 1, %s1131_s22  ;;  %s65_s25 = sadd.s32 1, %s1123_s20  ;;  %s1135_s23 = sphi %s1190_s23, %s20_s23   ;;  %s1131_s22 = sphi %s1188_s22, %s1525_s22   ;;  %s1127_s21 = sphi %s1186_s21, %s1524_s21   ;;  %s1123_s20 = sphi %s1184_s20, %s1523_s20   ;;  %s1119_s19 = sphi %s1182_s19, %s1522_s19   ;;  %s1115_s18 = sphi %s1180_s18, %s1521_s18  }
   0x9   : > { %p30_p0 = scmp.ge.s32.totalorder %s29_s24, 2  ;;  %p72_p1 = scmp.ne.s32.totalorder %s1123_s20, %s1119_s19 }
   0xa   : > { %p73_p2 = scmp.eq.s32.totalorder %s1135_s23, 0  ;;  %p892_p4 = scmp.lt.s32.totalorder %s1135_s23, 2 }
   0xb   : > { %s1527_s24 = smov (%p30_p0, %s29_s24), 0  ;;  %s220_s27 = sand.u32 1, %s1135_s23  }
   0xc   : > { %p74_p3 = por %p73_p2, %p72_p1  ;;  %s62_s26 = ssub.s32 %s1131_s22, %s1527_s24 }
   0xd   : > { %p63_p5 = scmp.eq.s32.totalorder %s62_s26, 0  ;;  %s222_s28 = sand.u32 1, %s1123_s20  }
   0xe   : > { %s764_s29 = sshll.u32 %s1131_s22, 8  ;;  %s1226_s6 = sshll.u32 %s222_s28, 8 }
   0xf   : > { %s1224_s30 = scalar_select %p63_p5, %s1123_s20, %s65_s25  }
  0x10   : > { %s1509_s1 = sld [smem:[#allocation13_spill]]  ;;  %p1233_p6 = pnand %p892_p4, %p74_p3 }
  0x11   : > { %s224_s11 = scalar_lea.vmem [#allocation6], %s1226_s6  ;;  %s1240_s13 = scalar_lea.sflag [#allocation7], %s220_s27 }
  0x12   : > { %s1510_s10 = scalar_select %p1233_p6, 1, 0 }
  0x13   : > { %s231_s12 = sshll.u32 %s224_s11, 4  ;;  %p1503_p8 = pneg %p1233_p6  ;;  %s1238_s12 = int_to_ptr.vmem [resolvable:$true] %s231_s12 }
  0x16   : > { %s1231_s9 = scalar_lea.hbm %s1509_s1, %s764_s29  ;;  %s968_s17 = scalar_lea.hbm %s1509_s1, 8192 }
  0x17   : > { %s963_s14 = scalar_lea.hbm %s1231_s9, 4096  ;;  %p969_p11 = scmp.lt.u32.totalorder %s1231_s9, %s1509_s1 }
  0x18   : > { %p964_p7 = scmp.ne.s32.totalorder %s1231_s9, %s963_s14  ;;  %p970_p12 = scmp.lt.u32.totalorder %s968_s17, %s963_s14 }
  0x19   : > { %p972_p0 = scmp.lt.u32.totalorder %s963_s14, %s1231_s9 }
  0x1a   : > { %p966_p9 = pnand %p1503_p8, %p964_p7  ;;  %p971_p13 = por %p970_p12, %p969_p11 }
  0x1c   : > { %p967_p10 = pneg %p966_p9  ;;  %p973_p1 = por %p972_p0, %p971_p13 }
  0x1e   : > { %p974_p2 = pnand %p973_p1, %p967_p10 }
  0x20   : > { %977 = shalt.err (!%p974_p2)
}
  0x21   : > { %s978_s27 = scalar_lea.vmem %s1238_s12, 4096  ;;  %s1137_s28 = smov [#allocation6]  }
  0x22   : > { %p979_p3 = scmp.ne.s32.totalorder %s1238_s12, %s978_s27  ;;  %s983_s29 = sshll.u32 %s1137_s28, 4  ;;  %s984_s29 = int_to_ptr.vmem [resolvable:$false] %s983_s29 }
  0x23   : > { %s985_s7 = scalar_lea.vmem %s984_s29, 8192  ;;  %p986_p7 = scmp.lt.s32.totalorder %s1238_s12, %s984_s29 }
  0x24   : > { %p981_p4 = pnand %p979_p3, %p1503_p8  ;;  %p987_p9 = scmp.lt.s32.totalorder %s985_s7, %s978_s27 }
  0x26   : > { %p982_p5 = pneg %p981_p4  ;;  %p988_p11 = por %p987_p9, %p986_p7 }
  0x28   : > { %p989_p12 = pnand %p988_p11, %p982_p5 }
  0x2a   : > { %992 = shalt.err (!%p989_p12)
}
  0x2b   : > { %s1138_s8 = smov 512   ;;  %s1139_s11 = smov 256  }
  0x2c   : > { %s1140_s14 = smov 16   ;;  %s1269_s15 = sadd.s32 4294967295, %s1135_s23  }
  0x2d   : > { %887 = dma.hbm_to_vmem [thread:$0]  (!%p1233_p6), %s1231_s9, 4096, %s1238_s12, %s1240_s13, %s1138_s8, %s1139_s11, %s1140_s14  }
  0x2e   : > { %p78_p10 = scmp.ne.s32.totalorder %s1119_s19, %s1115_s18  ;;  %p1502_p13 = scmp.eq.s32.totalorder %s1269_s15, 0 }
  0x2f   : > { %p743_p0 = scmp.ge.s32.totalorder %s1135_s23, 1  ;;  %p188_p1 = scmp.lt.s32.totalorder %s1135_s23, 3 }
  0x30   : > { %p1278_p2 = por %p1502_p13, %p78_p10  ;;  %s1141_s9 = smov [#allocation3]  }
  0x31   : > { %p1282_p3 = pnand %p743_p0, %p188_p1  ;;  %s203_s12 = sshll.u32 %s1141_s9, 4  ;;  %s1286_s12 = int_to_ptr.vmem [resolvable:$true] %s203_s12 }
  0x32   : > { %s1511_s16 = scalar_select %p1278_p2, 1, 0 }
  0x33   : > { %s1512_s17 = scalar_select %p1282_p3, 1, 0 }
  0x34   : > { %p880_p4 = pneg %p1282_p3  ;;  %s765_s18 = sshll.u32 %s1131_s22, 12 }
  0x35   : > { %s1300_s28 = scalar_lea.hbm %s1499_s3, %s765_s18  ;;  %s253_s29 = scalar_lea.vmem [#allocation8], %s1226_s6 }
  0x36   : > { %p1293_p5 = pnand %p880_p4, %p1502_p13  ;;  %s260_s7 = sshll.u32 %s253_s29, 4  ;;  %s1303_s7 = int_to_ptr.vmem [resolvable:$true] %s260_s7 }
  0x37   : > { %s993_s14 = scalar_lea.hbm %s1496_s0, 256 }
  0x38   : > { %p994_p7 = scmp.ne.s32.totalorder %s1496_s0, %s993_s14  ;;  %p995_p9 = pneg %p1293_p5 }
  0x39   : > { %p1000_p10 = scmp.lt.u32.totalorder %s993_s14, %s1496_s0 }
  0x3a   : > { %p996_p11 = pnand %p995_p9, %p994_p7 }
  0x3c   : > { %p997_p12 = pneg %p996_p11 }
  0x3e   : > { %p1002_p0 = pnand %p1000_p10, %p997_p12 }
  0x40   : > { %1005 = shalt.err (!%p1002_p0)
}
  0x41   : > { %s1006_s6 = scalar_lea.vmem %s1286_s12, 256  ;;  %p1014_p8 = scmp.lt.s32.totalorder %s1286_s12, %s1286_s12 }
  0x42   : > { %p1007_p1 = scmp.ne.s32.totalorder %s1286_s12, %s1006_s6  ;;  %p1015_p2 = scmp.lt.s32.totalorder %s1006_s6, %s1006_s6 }
  0x44   : > { %p1009_p4 = pnand %p1007_p1, %p995_p9  ;;  %p1016_p3 = por %p1015_p2, %p1014_p8 }
  0x46   : > { %p1010_p13 = pneg %p1009_p4 }
  0x48   : > { %p1017_p6 = pnand %p1016_p3, %p1010_p13 }
  0x4a   : > { %1020 = shalt.err (!%p1017_p6)
}
  0x4b   : > { %s1142_s1 = smov 128   ;;  %s1143_s18 = smov 8  }
  0x4c   : > { %883 = dma.hbm_to_vmem [thread:$0]  (!%p1293_p5), %s1496_s0, 256, %s1286_s12, [#allocation4], %s1142_s1, %s1142_s1, %s1143_s18  }
  0x4d   : > { %s1021_s11 = scalar_lea.hbm %s1300_s28, 4096  ;;  %p1514_p6 = scmp.ne.s32.totalorder %s1510_s10, 0 }
  0x4e   : > { %p1022_p8 = scmp.ne.s32.totalorder %s1300_s28, %s1021_s11  ;;  %s1026_s26 = scalar_lea.hbm %s1499_s3, 8192 }
  0x4f   : > { %p1515_p13 = pneg %p1514_p6  ;;  %p1027_p7 = scmp.lt.u32.totalorder %s1300_s28, %s1499_s3 }
  0x50   : > { %p1028_p9 = scmp.lt.u32.totalorder %s1026_s26, %s1021_s11  ;;  %p1030_p12 = scmp.lt.u32.totalorder %s1021_s11, %s1300_s28 }
  0x51   : > { %p1024_p2 = pnand %p1022_p8, %p1515_p13 }
  0x52   : > { %p1029_p11 = por %p1028_p9, %p1027_p7 }
  0x53   : > { %p1025_p3 = pneg %p1024_p2 }
  0x54   : > { %p1031_p10 = por %p1030_p12, %p1029_p11 }
  0x56   : > { %p1032_p0 = pnand %p1031_p10, %p1025_p3 }
  0x58   : > { %1035 = shalt.err (!%p1032_p0)
}
  0x59   : > { %s1036_s12 = scalar_lea.vmem %s1303_s7, 4096  ;;  %p1516_p1 = pmov %p1515_p13 }
  0x5a   : > { %p1037_p5 = scmp.ne.s32.totalorder %s1303_s7, %s1036_s12  ;;  %s1144_s25 = smov [#allocation8]  }
  0x5b   : > { %s1041_s29 = sshll.u32 %s1144_s25, 4  ;;  %s1042_s29 = int_to_ptr.vmem [resolvable:$false] %s1041_s29 }
  0x5c   : > { %p1039_p4 = pnand %p1037_p5, %p1516_p1  ;;  %s1043_s8 = scalar_lea.vmem %s1042_s29, 8192 }
  0x5d   : > { %p1044_p13 = scmp.lt.s32.totalorder %s1303_s7, %s1042_s29  ;;  %p1045_p2 = scmp.lt.s32.totalorder %s1043_s8, %s1036_s12 }
  0x5e   : > { %p1040_p8 = pneg %p1039_p4 }
  0x5f   : > { %p1046_p7 = por %p1045_p2, %p1044_p13 }
  0x61   : > { %p1047_p9 = pnand %p1046_p7, %p1040_p8 }
  0x63   : > { %1050 = shalt.err (!%p1047_p9)
}
  0x64   : > { %890 = dma.hbm_to_vmem [thread:$0]  (!%p1514_p6), %s1300_s28, 4096, %s1303_s7, %s1240_s13, %s1142_s1, %s1142_s1, %s1143_s18  }
  0x65   : > { %p1517_p3 = scmp.ne.s32.totalorder %s1512_s17, 0 }
  0x66   : > { %p1518_p11 = scmp.eq.s32.totalorder (!%p1517_p3), %s1269_s15, 0 }
  0x67   : > { %272 = sbr.rel (%p1517_p3) target bundleno = 660 (0x294), region = 40 }
  0x6e   : > { %1102 = dma.done.wait (%p1518_p11), [#allocation4], 256   ;;  %p1519_p12 = pmov %p1518_p11 }
  0x6f   : > { %s278_s10 = sand.u32 1, %s1269_s15   ;;  %s280_s11 = sand.u32 1, %s1119_s19  }
  0x70   : > { %1104 = vsyncadd (%p1519_p12), [#allocation4], 4294967040  ;;  %s754_s14 = sshll.u32 %s280_s11, 8  ;;  %s279_s9 = scalar_lea.sflag [#allocation7], %s278_s10 }
  0x71   : > { %s1364_s26 = scalar_lea.vmem [#allocation6], %s754_s14  ;;  %p1520_p10 = scmp.ne.s32.totalorder %s1511_s16, 0 }
  0x73   : > { %1106 = dma.done.wait (%p1520_p10), %s279_s9, 8192  }
  0x74   : > { %1108 = vsyncadd (%p1520_p10), %s279_s9, 4294959104  ;;  %s756_s13 = sshll.u32 %s1127_s21, 1  ;;  %s1377_s1 = scalar_lea.vmem [#allocation8], %s754_s14 }
  0x75   : > { %p325_p6 = scmp.lt.s32.totalorder %s756_s13, 3  ;;  %p757_p0 = scmp.ne.s32.totalorder %s1127_s21, 0 }
  0x76   : > { %v1145_v0 = vmov (!%p757_p0), 0.0  }
  0x77   : > { %s1529_s13 = smov (!%p325_p6, %s756_s13), 3  ;;  %334 = sbr.rel (%p757_p0) target bundleno = 126 (0x7e), region = 56 }
  0x78   : > { %s327_s7 = scalar_lea.vmem %s1498_s2, %s1529_s13  ;;  %335 = vst [vmem:[#allocation2] sm:$0xff] (!%p757_p0), %v1145_v0  ;;  %336 = vst [vmem:[#allocation2 + $0x8] sm:$0xff] (!%p757_p0), %v1145_v0 }
  0x7e PF: > { %v340_v1 = vld [vmem:[%s1364_s26 + $0x8] sm:$0xff]  ;;  %v342_v2 = vld [vmem:[%s1364_s26 + $0x18] sm:$0xff]  ;;  %v339_v3 = vld [vmem:[%s1364_s26] sm:$0xff]  ;;  %v1146_v8 = vmov 0.0   ;;  %p758_p5 = scmp.ne.s32.totalorder %s1127_s21, 1 }
  0x7f   : > { %v804_v4 = vpack.c.bf16 %v342_v2, %v340_v1  ;;  %v341_v5 = vld [vmem:[%s1364_s26 + $0x10] sm:$0xff]  ;;  %v344_v6 = vld [vmem:[%s1364_s26 + $0x28] sm:$0xff]  ;;  %v346_v7 = vld [vmem:[%s1364_s26 + $0x38] sm:$0xff]  ;;  %447 = vmatprep.mubr.f32.mxu0 %v1146_v8 }
  0x80   : > { %v806_v9 = vpack.c.bf16 %v341_v5, %v339_v3  ;;  %v808_v10 = vpack.c.bf16 %v346_v7, %v344_v6  ;;  %v343_v11 = vld [vmem:[%s1364_s26 + $0x20] sm:$0xff]  ;;  %v345_v12 = vld [vmem:[%s1364_s26 + $0x30] sm:$0xff]  ;;  %v348_v13 = vld [vmem:[%s1364_s26 + $0x48] sm:$0xff] }
  0x81   : > { %805 = vmatprep.subr.bf16.mxu0 %v804_v4  ;;  %v350_v14 = vld [vmem:[%s1364_s26 + $0x58] sm:$0xff]  ;;  %v810_v15 = vpack.c.bf16 %v345_v12, %v343_v11  ;;  %v347_v17 = vld [vmem:[%s1364_s26 + $0x40] sm:$0xff]  ;;  %v349_v18 = vld [vmem:[%s1364_s26 + $0x50] sm:$0xff] }
  0x82   : > { %807 = vmatpush1.bf16.msra.mxu0 %v806_v9  ;;  %v812_v16 = vpack.c.bf16 %v350_v14, %v348_v13  ;;  %v352_v19 = vld [vmem:[%s1364_s26 + $0x68] sm:$0xff]  ;;  %v354_v20 = vld [vmem:[%s1364_s26 + $0x78] sm:$0xff]  ;;  %v814_v21 = vpack.c.bf16 %v349_v18, %v347_v17  ;;  %v351_v23 = vld [vmem:[%s1364_s26 + $0x60] sm:$0xff] }
  0x83   : > { %809 = vmatprep.subr.bf16.mxu0 %v808_v10  ;;  %v816_v22 = vpack.c.bf16 %v354_v20, %v352_v19  ;;  %v353_v24 = vld [vmem:[%s1364_s26 + $0x70] sm:$0xff]  ;;  %v356_v25 = vld [vmem:[%s1364_s26 + $0x88] sm:$0xff]  ;;  %v358_v26 = vld [vmem:[%s1364_s26 + $0x98] sm:$0xff] }
  0x84   : > { %v514_v27 = vld [vmem:[%s1377_s1 + $0x80] sm:$0xff]  ;;  %v515_v28 = vld [vmem:[%s1377_s1 + $0x88] sm:$0xff]  ;;  %v818_v29 = vpack.c.bf16 %v353_v24, %v351_v23  ;;  %v820_v33 = vpack.c.bf16 %v358_v26, %v356_v25  ;;  %v357_v35 = vld [vmem:[%s1364_s26 + $0x90] sm:$0xff] }
  0x85   : > { %v836_v30 = vpack.c.bf16 %v515_v28, %v514_v27  ;;  %v498_v31 = vld [vmem:[%s1377_s1] sm:$0xff]  ;;  %v499_v32 = vld [vmem:[%s1377_s1 + $0x8] sm:$0xff]  ;;  %v362_v38 = vld [vmem:[%s1364_s26 + $0xb8] sm:$0xff] }
  0x86   : > { %811 = vmatpush1.bf16.msra.mxu0 %v810_v15  ;;  %v355_v34 = vld [vmem:[%s1364_s26 + $0x80] sm:$0xff]  ;;  %v838_v36 = vpack.c.bf16 %v499_v32, %v498_v31  ;;  %v360_v37 = vld [vmem:[%s1364_s26 + $0xa8] sm:$0xff]  ;;  %v361_v42 = vld [vmem:[%s1364_s26 + $0xb0] sm:$0xff] }
  0x87   : > { %813 = vmatprep.subr.bf16.mxu0 %v812_v16  ;;  %837 = vmatprep.subr.bf16.mxu1 %v836_v30  ;;  %v822_v39 = vpack.c.bf16 %v357_v35, %v355_v34  ;;  %v824_v40 = vpack.c.bf16 %v362_v38, %v360_v37  ;;  %v359_v41 = vld [vmem:[%s1364_s26 + $0xa0] sm:$0xff]  ;;  %v364_v43 = vld [vmem:[%s1364_s26 + $0xc8] sm:$0xff]  ;;  %v366_v44 = vld [vmem:[%s1364_s26 + $0xd8] sm:$0xff] }
  0x88   : > { %839 = vmatpush3.bf16.msra.mxu1 %v838_v36  ;;  %v826_v45 = vpack.c.bf16 %v361_v42, %v359_v41  ;;  %v828_v46 = vpack.c.bf16 %v366_v44, %v364_v43  ;;  %v363_v47 = vld [vmem:[%s1364_s26 + $0xc0] sm:$0xff]  ;;  %v365_v48 = vld [vmem:[%s1364_s26 + $0xd0] sm:$0xff]  ;;  %v368_v49 = vld [vmem:[%s1364_s26 + $0xe8] sm:$0xff]  ;;  %v373_v36 = vlaneseq }
  0x89   : > { %v370_v50 = vld [vmem:[%s1364_s26 + $0xf8] sm:$0xff]  ;;  %v830_v51 = vpack.c.bf16 %v365_v48, %v363_v47  ;;  %v367_v53 = vld [vmem:[%s1364_s26 + $0xe0] sm:$0xff]  ;;  %v369_v54 = vld [vmem:[%s1364_s26 + $0xf0] sm:$0xff] }
  0x8a   : > { %815 = vmatpush1.bf16.msra.mxu0 %v814_v21  ;;  %v832_v52 = vpack.c.bf16 %v370_v50, %v368_v49  ;;  %v834_v55 = vpack.c.bf16 %v369_v54, %v367_v53  ;;  %v337_v56 = vld [vmem:[#allocation3] sm:$0xff]  ;;  %v338_v57 = vld [vmem:[#allocation3 + $0x8] sm:$0xff]  ;;  %v518_v0 = vld [vmem:[%s1377_s1 + $0xa0] sm:$0xff]  ;;  %v374_v37 = vshrl.u32 %v373_v36, 7 }
  0x8b   : > { %817 = vmatprep.subr.bf16.mxu0 %v816_v22  ;;  %v516_v58 = vld [vmem:[%s1377_s1 + $0x90] sm:$0xff]  ;;  %v517_v59 = vld [vmem:[%s1377_s1 + $0x98] sm:$0xff]  ;;  %v519_v1 = vld [vmem:[%s1377_s1 + $0xa8] sm:$0xff] }
  0x8c   : > { %v840_v60 = vpack.c.bf16 %v517_v59, %v516_v58  ;;  %v500_v61 = vld [vmem:[%s1377_s1 + $0x10] sm:$0xff]  ;;  %v501_v62 = vld [vmem:[%s1377_s1 + $0x18] sm:$0xff]  ;;  %v844_v2 = vpack.c.bf16 %v519_v1, %v518_v0  ;;  %v502_v3 = vld [vmem:[%s1377_s1 + $0x20] sm:$0xff]  ;;  %v375_v38 = vsub.s32 0, %v374_v37 }
  0x8d   : > { %v842_v63 = vpack.c.bf16 %v501_v62, %v500_v61  ;;  %v503_v4 = vld [vmem:[%s1377_s1 + $0x28] sm:$0xff]  ;;  %v520_v6 = vld [vmem:[%s1377_s1 + $0xb0] sm:$0xff]  ;;  %v521_v7 = vld [vmem:[%s1377_s1 + $0xb8] sm:$0xff] }
  0x8e   : > { %819 = vmatpush1.bf16.msra.mxu0 %v818_v29  ;;  %841 = vmatprep.subr.bf16.mxu1 %v840_v60  ;;  %v846_v5 = vpack.c.bf16 %v503_v4, %v502_v3  ;;  %v504_v9 = vld [vmem:[%s1377_s1 + $0x30] sm:$0xff]  ;;  %v505_v10 = vld [vmem:[%s1377_s1 + $0x38] sm:$0xff]  ;;  %v522_v12 = vld [vmem:[%s1377_s1 + $0xc0] sm:$0xff] }
  0x8f   : > { %821 = vmatprep.subr.bf16.mxu0 %v820_v33  ;;  %843 = vmatpush3.bf16.msra.mxu1 %v842_v63  ;;  %v850_v11 = vpack.c.bf16 %v505_v10, %v504_v9  ;;  %v523_v13 = vld [vmem:[%s1377_s1 + $0xc8] sm:$0xff]  ;;  %v506_v14 = vld [vmem:[%s1377_s1 + $0x40] sm:$0xff]  ;;  %v524_v17 = vld [vmem:[%s1377_s1 + $0xd0] sm:$0xff] }
  0x90   : > { %845 = vmatprep.subr.bf16.mxu1 %v844_v2  ;;  %v852_v15 = vpack.c.bf16 %v523_v13, %v522_v12  ;;  %v507_v16 = vld [vmem:[%s1377_s1 + $0x48] sm:$0xff]  ;;  %v525_v18 = vld [vmem:[%s1377_s1 + $0xd8] sm:$0xff]  ;;  %v508_v21 = vld [vmem:[%s1377_s1 + $0x50] sm:$0xff] }
  0x91   : > { %v854_v19 = vpack.c.bf16 %v507_v16, %v506_v14  ;;  %v856_v20 = vpack.c.bf16 %v525_v18, %v524_v17  ;;  %v509_v22 = vld [vmem:[%s1377_s1 + $0x58] sm:$0xff]  ;;  %v526_v23 = vld [vmem:[%s1377_s1 + $0xe0] sm:$0xff]  ;;  %v527_v24 = vld [vmem:[%s1377_s1 + $0xe8] sm:$0xff] }
  0x92   : > { %823 = vmatpush1.bf16.msra.mxu0 %v822_v39  ;;  %v858_v25 = vpack.c.bf16 %v509_v22, %v508_v21  ;;  %v860_v26 = vpack.c.bf16 %v527_v24, %v526_v23  ;;  %v510_v27 = vld [vmem:[%s1377_s1 + $0x60] sm:$0xff]  ;;  %v511_v28 = vld [vmem:[%s1377_s1 + $0x68] sm:$0xff]  ;;  %v528_v29 = vld [vmem:[%s1377_s1 + $0xf0] sm:$0xff] }
  0x93   : > { %825 = vmatprep.subr.bf16.mxu0 %v824_v40  ;;  %847 = vmatpush3.bf16.msra.mxu1 %v846_v5  ;;  %v529_v30 = vld [vmem:[%s1377_s1 + $0xf8] sm:$0xff]  ;;  %v862_v31 = vpack.c.bf16 %v511_v28, %v510_v27  ;;  %v512_v33 = vld [vmem:[%s1377_s1 + $0x70] sm:$0xff]  ;;  %v371_v39 = vld [vmem:[%s327_s7] sm:$0x3]  ;;  %v379_v40 = vsub.s32 1, %v374_v37 }
  0x94   : > { %v864_v32 = vpack.c.bf16 %v529_v30, %v528_v29  ;;  %v513_v34 = vld [vmem:[%s1377_s1 + $0x78] sm:$0xff]  ;;  %v376_v41 = vrot.slane %v371_v39, %v375_v38  ;;  %v496_v24 = vld [vmem:[#allocation2] sm:$0xff]  ;;  %v497_v29 = vld [vmem:[#allocation2 + $0x8] sm:$0xff] }
  0x95   : > { %v866_v35 = vpack.c.bf16 %v513_v34, %v512_v33  ;;  %v380_v42 = vrot.slane %v371_v39, %v379_v40  ;;  %v759_v34 = vld [vmem:[%s1500_s4] ss:$0 sm:$0xff] (!%p758_p5) }
  0x96   : > { %827 = vmatpush1.bf16.msra.mxu0 %v826_v45 }
  0x97   : > { %829 = vmatprep.subr.bf16.mxu0 %v828_v46 }
  0x9a   : > { %831 = vmatpush1.bf16.msra.mxu0 %v830_v51 }
  0x9b   : > { %833 = vmatprep.subr.bf16.mxu0 %v832_v52 }
  0x9e   : > { %835 = vmatpush1.bf16.msra.mxu0 %v834_v55 }
  0xa1   : > { %448 = vmatmul.mubr.f32.vlgmr.msra.gmra.mrb[0].mxu0 %v337_v56 }
  0xa2   : > { %453 = vmatprep.mubr.f32.mxu0 %v1146_v8  ;;  %v848_v8 = vpack.c.bf16 %v521_v7, %v520_v6 }
  0xa4   : > { %849 = vmatprep.subr.bf16.mxu1 %v848_v8 }
  0xa5   : > { %454 = vmatmul.mubr.f32.gmra.mrb[2].mxu0 %v338_v57  ;;  %851 = vmatpush3.bf16.msra.mxu1 %v850_v11 }
  0xa6   : > { %853 = vmatprep.subr.bf16.mxu1 %v852_v15 }
  0xa9   : > { %855 = vmatpush3.bf16.msra.mxu1 %v854_v19 }
  0xaa   : > { %857 = vmatprep.subr.bf16.mxu1 %v856_v20 }
  0xad   : > { %859 = vmatpush3.bf16.msra.mxu1 %v858_v25 }
  0xae   : > { %861 = vmatprep.subr.bf16.mxu1 %v860_v26 }
  0xb1   : > { %863 = vmatpush3.bf16.msra.mxu1 %v862_v31 }
  0xb2   : > { %865 = vmatprep.subr.bf16.mxu1 %v864_v32 }
  0xb5   : > { %867 = vmatpush3.bf16.msra.mxu1 %v866_v35 }
 0x174   : > { %v449_v43 = vpop.f32.mrb[0].mxu0 }
 0x175   : > { %v450_v44 = vadd.f32 %v449_v43, %v376_v41  ;;  %v451_v45 = vpop.f32.mrb[1].mxu0 }
 0x176   : > { %v452_v46 = vadd.f32 %v451_v45, %v380_v42 }
 0x177   : > { %v464_v47 = vmul.f32 0.044715, %v450_v44  ;;  %v460_v12 = vmul.f32 0.5, %v450_v44 }
 0x178   : > { %v455_v48 = vpop.f32.mrb[2].mxu0  ;;  %v465_v49 = vmul.f32 0.044715, %v452_v46  ;;  %v461_v10 = vmul.f32 0.5, %v452_v46 }
 0x179   : > { %v468_v50 = vmul.f32 %v464_v47, %v450_v44  ;;  %v456_v51 = vadd.f32 %v455_v48, %v376_v41  ;;  %v457_v52 = vpop.f32.mrb[3].mxu0 }
 0x17a   : > { %v458_v53 = vadd.f32 %v457_v52, %v380_v42  ;;  %v469_v54 = vmul.f32 %v465_v49, %v452_v46 }
 0x17b   : > { %v466_v55 = vmul.f32 0.044715, %v456_v51  ;;  %v472_v56 = vmul.f32 %v468_v50, %v450_v44  ;;  %v462_v20 = vmul.f32 0.5, %v456_v51 }
 0x17c   : > { %v467_v57 = vmul.f32 0.044715, %v458_v53  ;;  %v473_v58 = vmul.f32 %v469_v54, %v452_v46  ;;  %v463_v18 = vmul.f32 0.5, %v458_v53 }
 0x17d   : > { %v470_v59 = vmul.f32 %v466_v55, %v456_v51  ;;  %v476_v60 = vadd.f32 %v472_v56, %v450_v44 }
 0x17e   : > { %v471_v61 = vmul.f32 %v467_v57, %v458_v53  ;;  %v477_v62 = vadd.f32 %v473_v58, %v452_v46 }
 0x17f   : > { %v480_v63 = vmul.f32 0.7978846, %v476_v60  ;;  %v474_v0 = vmul.f32 %v470_v59, %v456_v51 }
 0x180   : > { %v481_v1 = vmul.f32 0.7978846, %v477_v62  ;;  %v475_v2 = vmul.f32 %v471_v61, %v458_v53 }
 0x181   : > { %955 = vtanh.f32 %v480_v63  ;;  %v478_v3 = vadd.f32 %v474_v0, %v456_v51 }
 0x182   : > { %957 = vtanh.f32 %v481_v1  ;;  %v479_v4 = vadd.f32 %v475_v2, %v458_v53 }
 0x183   : > { %v482_v5 = vmul.f32 0.7978846, %v478_v3 }
 0x184   : > { %v483_v6 = vmul.f32 0.7978846, %v479_v4 }
 0x185   : > { %959 = vtanh.f32 %v482_v5 }
 0x186   : > { %961 = vtanh.f32 %v483_v6 }
 0x18b   : > { %v956_v7 = vpop.eup %955 }
 0x18c   : > { %v958_v8 = vpop.eup %957  ;;  %v488_v9 = vadd.f32 1.0, %v956_v7 }
 0x18d   : > { %v489_v11 = vadd.f32 1.0, %v958_v8 }
 0x18e   : > { %v492_v16 = vmul.f32 %v488_v9, %v460_v12 }
 0x18f   : > { %v960_v13 = vpop.eup %959  ;;  %v493_v14 = vmul.f32 %v489_v11, %v461_v10 }
 0x190   : > { %v962_v15 = vpop.eup %961  ;;  %v490_v17 = vadd.f32 1.0, %v960_v13 }
 0x191   : > { %594 = vmatprep.mubr.f32.mxu1 %v493_v14  ;;  %v491_v19 = vadd.f32 1.0, %v962_v15 }
 0x192   : > { %595 = vmatmul.mubr.f32.vlgmr.msra.gmra.mrb[0].mxu1 %v492_v16  ;;  %v494_v22 = vmul.f32 %v490_v17, %v462_v20 }
 0x193   : > { %v495_v21 = vmul.f32 %v491_v19, %v463_v18 }
 0x195   : > { %599 = vmatprep.mubr.f32.mxu1 %v495_v21 }
 0x196   : > { %600 = vmatmul.mubr.f32.gmra.mrb[2].mxu1 %v494_v22 }
 0x265   : > { %v798_v23 = vpop.f32.mrb[0].mxu1 }
 0x266   : > { %v799_v25 = vpop.f32.mrb[1].mxu1 }
 0x267   : > { %v800_v26 = vadd.f32 %v799_v25, %v798_v23 }
 0x269   : > { %v605_v27 = vadd.f32 %v800_v26, %v496_v24  ;;  %v801_v28 = vpop.f32.mrb[2].mxu1  ;;  %612 = sbr.rel (%p758_p5) target bundleno = 634 (0x27a), region = 60 }
 0x26a   : > { %v802_v30 = vpop.f32.mrb[3].mxu1 }
 0x26b   : > { %607 = vst [vmem:[#allocation2] sm:$0xff] %v605_v27  ;;  %v803_v31 = vadd.f32 %v802_v30, %v801_v28 }
 0x26d   : > { %v606_v32 = vadd.f32 %v803_v31, %v497_v29 }
 0x26f   : > { %608 = vst [vmem:[#allocation2 + $0x8] sm:$0xff] %v606_v32 }
 0x272   : > { %v613_v33 = vld [vmem:[#allocation2] sm:$0xff] }
 0x273   : > { %v622_v36 = vadd.f32 %v759_v34, %v613_v33 }
 0x275   : > { %624 = vst [vmem:[#allocation9] sm:$0xff] %v622_v36 }
 0x276   : > { %v614_v35 = vld [vmem:[#allocation2 + $0x8] sm:$0xff] }
 0x277   : > { %v623_v37 = vadd.f32 %v759_v34, %v614_v35 }
 0x279   : > { %625 = vst [vmem:[#allocation9 + $0x8] sm:$0xff] %v623_v37 }
 0x27a PF: > { %p894_p1 = scmp.eq.s32.totalorder %s1269_s15, 1  ;;  %s1147_s12 = smov [#allocation9]  }
 0x27b   : > { %s635_s25 = sshll.u32 %s1147_s12, 4  ;;  %s636_s25 = int_to_ptr.vmem [resolvable:$true] %s635_s25 }
 0x27c   : > { %s1051_s29 = scalar_lea.vmem %s636_s25, 256  ;;  %p1058_p2 = scmp.lt.s32.totalorder %s636_s25, %s636_s25 }
 0x27d   : > { %p1052_p4 = scmp.ne.s32.totalorder %s636_s25, %s1051_s29  ;;  %p1059_p7 = scmp.lt.s32.totalorder %s1051_s29, %s1051_s29 }
 0x27f   : > { %p1053_p8 = pnand %p1052_p4, %p894_p1  ;;  %p1060_p9 = por %p1059_p7, %p1058_p2 }
 0x281   : > { %p1054_p13 = pneg %p1053_p8 }
 0x283   : > { %p1061_p3 = pnand %p1060_p9, %p1054_p13 }
 0x285   : > { %1064 = shalt.err (!%p1061_p3)
}
 0x286   : > { %s1065_s10 = scalar_lea.hbm %s1501_s5, 256 }
 0x287   : > { %p1066_p11 = scmp.ne.s32.totalorder %s1501_s5, %s1065_s10  ;;  %p1071_p6 = scmp.lt.u32.totalorder %s1065_s10, %s1501_s5 }
 0x289   : > { %p1067_p12 = pnand %p1066_p11, %p894_p1 }
 0x28b   : > { %p1068_p10 = pneg %p1067_p12 }
 0x28d   : > { %p1073_p0 = pnand %p1071_p6, %p1068_p10 }
 0x28f   : > { %1076 = shalt.err (!%p1073_p0)
}
 0x290   : > { %s1148_s13 = smov 128   ;;  %s1149_s17 = smov 8  }
 0x291   : > { %877 = dma.vmem_to_hbm [thread:$0]  (%p894_p1), %s636_s25, 256, %s1501_s5, [#allocation5], %s1148_s13, %s1148_s13, %s1149_s17  }
 0x292   : > { %1110 = dma.done.wait (%p894_p1), [#allocation5], 256  }
 0x293   : > { %1112 = vsyncadd (%p894_p1), [#allocation5], 4294967040 }
 0x294 PF: > { %s20_s23 = sadd.s32 1, %s1135_s23   ;;  %s1521_s18 = smov %s1119_s19 }
 0x295   : > { %p17_p5 = scmp.ge.s32.totalorder %s20_s23, 4   ;;  %s1522_s19 = smov %s1123_s20 }
 0x296   : > { %s1523_s20 = smov %s1224_s30  ;;  %s1524_s21 = smov %s1131_s22 }
 0x297   : > { %s1525_s22 = smov %s1527_s24  ;;  %19 = sbr.rel (!%p17_p5) target bundleno = 8 (0x8), region = 106 }
 0x29e   :  { %651 = vsyncpa [#allocation4], 1 }
 0x29f   :  { %653 = vsyncpa [#allocation4 + $0x1], 1 }
 0x2a0   :  { %654 = vsyncpa [#allocation7], 1 }
 0x2a1   :  { %656 = vsyncpa [#allocation7 + $0x1], 1 }
 0x2a2   :  { %657 = vsyncpa [#allocation5], 1 }
 0x2a3   :  { %659 = vsyncpa [#allocation5 + $0x1], 1 }

</bundles_post_ra>
